<compile_context>
chip_gen: v5e
topology: v5e:2x2
jax: 0.10.0
libtpu: 0.0.40
codegen_flags: <defaults>
</compile_context>

<pallas_src>
import functools

import jax
import jax.numpy as jnp
from jax import lax
from jax.experimental import pallas as pl
from jax.experimental.pallas import tpu as pltpu


def _round_up(x: int, m: int) -> int:
    return (x + m - 1) // m * m


def _vmem_capacity_bytes() -> int:
    try:
        cap = getattr(pltpu.get_tpu_info(), "vmem_capacity_bytes", None)
        if cap:
            return int(cap)
    except Exception:
        pass
    return 64 * 1024 * 1024  # conservative (v7x per-TC physical VMEM)


def _select_tiles(M, Cin, h_p, cout_p, budget):
    """Pick (tm, th). Big tm amortizes weight re-streaming from HBM; big th
    shortens / removes the reduction axis. Both bounded by the VMEM budget."""

    def usage(tm, th):
        x_b = 2 * tm * Cin * 4          # f32 activation tile (double buffered)
        w1_b = 2 * Cin * th * 2         # bf16 w1 slice
        b1_b = 2 * th * 4
        w2_b = 2 * th * cout_p * 2      # bf16 w2 slice
        b2_b = 2 * cout_p * 4
        o_b = 2 * tm * cout_p * 4       # f32 resident output / accumulator
        h_b = tm * th * (4 + 2)         # f32 intermediate + bf16 copy for fc2
        return x_b + w1_b + b1_b + w2_b + b2_b + o_b + h_b

    tm_cap = min(1024, _round_up(M, 8))
    tm_opts = sorted(
        {t for t in (tm_cap, 1024, 512, 256, 128, 64, 32, 16, 8) if t <= tm_cap},
        reverse=True,
    )
    # th must evenly divide h_p (ragged H blocks would feed garbage into the
    # fc2 reduction); any multiple of 128 dividing the 128-padded h_p is fine.
    th_opts = [d for d in range(h_p, 127, -128) if h_p % d == 0]

    for tm in tm_opts:            # biggest tm first: cuts weight HBM traffic
        for th in th_opts:        # biggest th first: collapses the k axis
            if usage(tm, th) <= budget:
                return tm, th
    return tm_opts[-1], 128       # minimal fallback


def _mlp_kernel(x_ref, w1_ref, b1_ref, w2_ref, b2_ref, o_ref):
    # x_ref:  (tm, Cin)    f32 (cast to bf16 in-kernel)
    # w1_ref: (Cin, th)    bf16      b1_ref: (1, th)      f32
    # w2_ref: (th, cout_p) bf16      b2_ref: (1, cout_p)  f32
    # o_ref:  (tm, cout_p) f32 — resident across k; accumulated directly.
    k = pl.program_id(1)

    xb = x_ref[...].astype(jnp.bfloat16)
    # fc1 on this H-slice (bf16 operands, f32 accumulation), bias + GELU in f32.
    h = jnp.dot(xb, w1_ref[...], preferred_element_type=jnp.float32)
    h = h + b1_ref[...]
    # exact GELU (matches torch.nn.GELU default): 0.5 * x * (1 + erf(x/sqrt(2)))
    h = 0.5 * h * (1.0 + lax.erf(h * 0.7071067811865476))

    # fc2 partial product for this H-slice.
    p = jnp.dot(h.astype(jnp.bfloat16), w2_ref[...],
                preferred_element_type=jnp.float32)

    @pl.when(k == 0)
    def _():
        o_ref[...] = p + b2_ref[...]

    @pl.when(k > 0)
    def _():
        o_ref[...] += p


@functools.partial(jax.jit, static_argnames=("tm", "th", "cout", "vmem_limit"))
def _mlp_pallas(x2d, w1_p, b1_p, w2_p, b2_p, *, tm, th, cout, vmem_limit):
    M, Cin = x2d.shape
    h_p = w1_p.shape[1]
    cout_p = w2_p.shape[1]
    grid = (pl.cdiv(M, tm), h_p // th)

    # Zero-padded H / Cout columns are exact: GELU(0)=0 and the padded w2 rows
    # are zero, so they contribute nothing.  Ragged last M block is safe: rows
    # are independent, OOB reads only produce garbage rows whose writeback is
    # clipped to the real output extent.
    cost = pl.CostEstimate(
        flops=2 * M * Cin * h_p + 2 * M * h_p * cout_p,
        transcendentals=M * h_p,
        bytes_accessed=(
            M * Cin * 4
            + grid[0] * (Cin * h_p * 2 + h_p * cout_p * 2 + h_p * 4 + cout_p * 4)
            + M * cout_p * 4
        ),
    )

    out_pad = pl.pallas_call(
        _mlp_kernel,
        out_shape=jax.ShapeDtypeStruct((M, cout_p), jnp.float32),
        grid_spec=pltpu.PrefetchScalarGridSpec(
            num_scalar_prefetch=0,
            grid=grid,
            in_specs=[
                pl.BlockSpec((tm, Cin), lambda i, k: (i, 0)),     # x tile (resident over k)
                pl.BlockSpec((Cin, th), lambda i, k: (0, k)),     # w1 H-slice
                pl.BlockSpec((1, th), lambda i, k: (0, k)),       # b1 H-slice
                pl.BlockSpec((th, cout_p), lambda i, k: (k, 0)),  # w2 H-slice
                pl.BlockSpec((1, cout_p), lambda i, k: (0, 0)),   # b2
            ],
            out_specs=pl.BlockSpec((tm, cout_p), lambda i, k: (i, 0)),
        ),
        compiler_params=pltpu.CompilerParams(
            dimension_semantics=("parallel", "arbitrary"),
            vmem_limit_bytes=vmem_limit,
        ),
        cost_estimate=cost,
    )(x2d, w1_p, b1_p, w2_p, b2_p)

    return out_pad[:, :cout]


def prepare_mlp_params(w1, b1, w2, b2):
    """Pad H/Cout to lane-dense multiples of 128 and cast weights to bf16 ONCE
    (outside the per-call path); the padded params are reused every forward."""
    Cin, H = w1.shape
    Cout = w2.shape[1]
    h_p = _round_up(H, 128)
    cout_p = _round_up(Cout, 128)
    return dict(
        w1=jnp.pad(w1, ((0, 0), (0, h_p - H))).astype(jnp.bfloat16),
        b1=jnp.pad(b1.reshape(1, H), ((0, 0), (0, h_p - H))).astype(jnp.float32),
        w2=jnp.pad(w2, ((0, h_p - H), (0, cout_p - Cout))).astype(jnp.bfloat16),
        b2=jnp.pad(b2.reshape(1, Cout), ((0, 0), (0, cout_p - Cout))).astype(jnp.float32),
        cin=Cin, h=H, cout=Cout,
    )


def mlp_forward(x, params):
    """x: (B, N, Cin) float32. Returns (B, N, Cout) float32."""
    B, N, Cin = x.shape
    assert Cin == params["cin"]
    M = B * N
    h_p = params["w1"].shape[1]
    cout_p = params["w2"].shape[1]

    phys = _vmem_capacity_bytes()
    vmem_limit = max(32 * 1024 * 1024,
                     min(phys - 16 * 1024 * 1024, 112 * 1024 * 1024))
    budget = int(vmem_limit * 0.75)
    tm, th = _select_tiles(M, Cin, h_p, cout_p, budget)

    out2d = _mlp_pallas(
        x.reshape(M, Cin), params["w1"], params["b1"], params["w2"], params["b2"],
        tm=tm, th=th, cout=params["cout"], vmem_limit=int(vmem_limit),
    )
    return out2d.reshape(B, N, params["cout"])


def _reference_mlp(x, w1, b1, w2, b2):
    h = jnp.einsum("bnc,ch->bnh", x, w1) + b1
    h = 0.5 * h * (1.0 + lax.erf(h / jnp.sqrt(2.0)))
    return jnp.einsum("bnh,ho->bno", h, w2) + b2


if __name__ == "__main__":
    # Small shapes consistent with the module: batch=2, seq=8,
    # in_features=32, hidden_features=64, out_features=32.
    B, N, Cin, H, Cout = 2, 8, 32, 64, 32

    key = jax.random.PRNGKey(0)
    kx, k1, k2, k3, k4 = jax.random.split(key, 5)

    x = jax.random.normal(kx, (B, N, Cin), dtype=jnp.float32)

    # Deterministic init mimicking nn.Linear's uniform(-1/sqrt(fan_in), 1/sqrt(fan_in)).
    bound1 = 1.0 / jnp.sqrt(jnp.float32(Cin))
    bound2 = 1.0 / jnp.sqrt(jnp.float32(H))
    w1 = jax.random.uniform(k1, (Cin, H), jnp.float32, -bound1, bound1)
    b1 = jax.random.uniform(k2, (H,), jnp.float32, -bound1, bound1)
    w2 = jax.random.uniform(k3, (H, Cout), jnp.float32, -bound2, bound2)
    b2 = jax.random.uniform(k4, (Cout,), jnp.float32, -bound2, bound2)

    params = prepare_mlp_params(w1, b1, w2, b2)   # one-time pad/cast of weights
    out = mlp_forward(x, params)
    out = jax.block_until_ready(out)

    ref = _reference_mlp(x, w1, b1, w2, b2)
    assert out.shape == (B, N, Cout)
    # bf16 matmul operands with f32 accumulation -> loosened tolerance vs f32 ref.
    assert jnp.allclose(out, ref, atol=2e-2, rtol=2e-2), "mismatch vs reference"

    print("KERNEL_OK")
</pallas_src>

<mosaic_0001>
module attributes {stable_mosaic.version = 11 : i64} {
  func.func @_mlp_kernel(%arg0: i32, %arg1: i32, %arg2: memref<16x32xf32, #tpu.memory_space<vmem>>, %arg3: memref<32x128xbf16, #tpu.memory_space<vmem>>, %arg4: memref<1x128xf32, #tpu.memory_space<vmem>>, %arg5: memref<128x128xbf16, #tpu.memory_space<vmem>>, %arg6: memref<1x128xf32, #tpu.memory_space<vmem>>, %arg7: memref<16x128xf32, #tpu.memory_space<vmem>>) attributes {dimension_semantics = [#tpu.dimension_semantics<parallel>, #tpu.dimension_semantics<arbitrary>], iteration_bounds = array<i64: 1, 1>, scalar_prefetch = 0 : i64, scratch_operands = 0 : i64, tpu.core_type = #tpu.core_type<tc>, window_params = [{transform_indices = @transform_0, window_bounds = array<i64: 16, 32>}, {transform_indices = @transform_1, window_bounds = array<i64: 32, 128>}, {transform_indices = @transform_2, window_bounds = array<i64: 1, 128>}, {transform_indices = @transform_3, window_bounds = array<i64: 128, 128>}, {pipeline_mode = #tpu.pipeline_mode<synchronous>, transform_indices = @transform_4, window_bounds = array<i64: 1, 128>}, {transform_indices = @transform_5, window_bounds = array<i64: 16, 128>}]} {
    %c0 = arith.constant 0 : index
    %c0_0 = arith.constant 0 : index
    %0 = vector.load %arg2[%c0, %c0_0] : memref<16x32xf32, #tpu.memory_space<vmem>>, vector<16x32xf32>
    %1 = arith.truncf %0 : vector<16x32xf32> to vector<16x32xbf16>
    %c0_1 = arith.constant 0 : index
    %c0_2 = arith.constant 0 : index
    %2 = vector.load %arg3[%c0_1, %c0_2] : memref<32x128xbf16, #tpu.memory_space<vmem>>, vector<32x128xbf16>
    %cst = arith.constant dense<0.000000e+00> : vector<16x128xf32>
    %3 = tpu.matmul %1, %2, %cst {dimension_numbers = #tpu.dot_dimension_numbers<[1], [0], [0], [1], [0, 0, 1, 1], [], []>} : vector<16x32xbf16>, vector<32x128xbf16>, vector<16x128xf32> -> vector<16x128xf32>
    %c0_3 = arith.constant 0 : index
    %c0_4 = arith.constant 0 : index
    %4 = vector.load %arg4[%c0_3, %c0_4] : memref<1x128xf32, #tpu.memory_space<vmem>>, vector<1x128xf32>
    %5 = vector.broadcast %4 : vector<1x128xf32> to vector<16x128xf32>
    %6 = arith.addf %3, %5 : vector<16x128xf32>
    %cst_5 = arith.constant 5.000000e-01 : f32
    %7 = vector.broadcast %cst_5 : f32 to vector<16x128xf32>
    %8 = arith.mulf %7, %6 : vector<16x128xf32>
    %cst_6 = arith.constant 0.707106769 : f32
    %9 = vector.broadcast %cst_6 : f32 to vector<16x128xf32>
    %10 = arith.mulf %6, %9 : vector<16x128xf32>
    %11 = math.erf %10 : vector<16x128xf32>
    %cst_7 = arith.constant 1.000000e+00 : f32
    %12 = vector.broadcast %cst_7 : f32 to vector<16x128xf32>
    %13 = arith.addf %12, %11 : vector<16x128xf32>
    %14 = arith.mulf %8, %13 : vector<16x128xf32>
    %15 = arith.truncf %14 : vector<16x128xf32> to vector<16x128xbf16>
    %c0_8 = arith.constant 0 : index
    %c0_9 = arith.constant 0 : index
    %16 = vector.load %arg5[%c0_8, %c0_9] : memref<128x128xbf16, #tpu.memory_space<vmem>>, vector<128x128xbf16>
    %cst_10 = arith.constant dense<0.000000e+00> : vector<16x128xf32>
    %17 = tpu.matmul %15, %16, %cst_10 {dimension_numbers = #tpu.dot_dimension_numbers<[1], [0], [0], [1], [0, 0, 1, 1], [], []>} : vector<16x128xbf16>, vector<128x128xbf16>, vector<16x128xf32> -> vector<16x128xf32>
    %c0_i32 = arith.constant 0 : i32
    %18 = arith.cmpi eq, %arg1, %c0_i32 : i32
    %19 = arith.extui %18 : i1 to i32
    %c0_i32_11 = arith.constant 0 : i32
    %20 = arith.cmpi ne, %19, %c0_i32_11 : i32
    scf.if %20 {
      %c0_14 = arith.constant 0 : index
      %c0_15 = arith.constant 0 : index
      %24 = vector.load %arg6[%c0_14, %c0_15] : memref<1x128xf32, #tpu.memory_space<vmem>>, vector<1x128xf32>
      %25 = vector.broadcast %24 : vector<1x128xf32> to vector<16x128xf32>
      %26 = arith.addf %17, %25 : vector<16x128xf32>
      %c0_16 = arith.constant 0 : index
      %c0_17 = arith.constant 0 : index
      %27 = vector.load %arg7[%c0_16, %c0_17] : memref<16x128xf32, #tpu.memory_space<vmem>>, vector<16x128xf32>
      tpu.vector_store %arg7[%c0_16, %c0_17], %26 {strides = array<i32>} : memref<16x128xf32, #tpu.memory_space<vmem>>, vector<16x128xf32>,
    } else {
    }
    %c0_i32_12 = arith.constant 0 : i32
    %21 = arith.cmpi sgt, %arg1, %c0_i32_12 : i32
    %22 = arith.extui %21 : i1 to i32
    %c0_i32_13 = arith.constant 0 : i32
    %23 = arith.cmpi ne, %22, %c0_i32_13 : i32
    scf.if %23 {
      %c0_14 = arith.constant 0 : index
      %c0_15 = arith.constant 0 : index
      %24 = vector.load %arg7[%c0_14, %c0_15] : memref<16x128xf32, #tpu.memory_space<vmem>>, vector<16x128xf32>
      %25 = arith.addf %24, %17 : vector<16x128xf32>
      %c0_16 = arith.constant 0 : index
      %c0_17 = arith.constant 0 : index
      %26 = vector.load %arg7[%c0_16, %c0_17] : memref<16x128xf32, #tpu.memory_space<vmem>>, vector<16x128xf32>
      tpu.vector_store %arg7[%c0_16, %c0_17], %25 {strides = array<i32>} : memref<16x128xf32, #tpu.memory_space<vmem>>, vector<16x128xf32>,
    } else {
    }
    return
  }
  func.func @transform_0(%arg0: i32, %arg1: i32) -> (i32, i32) {
    %c0_i32 = arith.constant 0 : i32
    %c0_i32_0 = arith.constant 0 : i32
    return %arg0, %c0_i32 : i32, i32
  }
  func.func @transform_1(%arg0: i32, %arg1: i32) -> (i32, i32) {
    %c0_i32 = arith.constant 0 : i32
    %c0_i32_0 = arith.constant 0 : i32
    return %c0_i32, %arg1 : i32, i32
  }
  func.func @transform_2(%arg0: i32, %arg1: i32) -> (i32, i32) {
    %c0_i32 = arith.constant 0 : i32
    %c0_i32_0 = arith.constant 0 : i32
    return %c0_i32, %arg1 : i32, i32
  }
  func.func @transform_3(%arg0: i32, %arg1: i32) -> (i32, i32) {
    %c0_i32 = arith.constant 0 : i32
    %c0_i32_0 = arith.constant 0 : i32
    return %arg1, %c0_i32 : i32, i32
  }
  func.func @transform_4(%arg0: i32, %arg1: i32) -> (i32, i32) {
    %c0_i32 = arith.constant 0 : i32
    %c0_i32_0 = arith.constant 0 : i32
    %c0_i32_1 = arith.constant 0 : i32
    return %c0_i32, %c0_i32_0 : i32, i32
  }
  func.func @transform_5(%arg0: i32, %arg1: i32) -> (i32, i32) {
    %c0_i32 = arith.constant 0 : i32
    %c0_i32_0 = arith.constant 0 : i32
    return %arg0, %c0_i32 : i32, i32
  }
}

</mosaic_0001>

<bundles_post_ra>
// kernel: _mlp_pallas.1
= control target key start
LH: loop header
LB: loop body
LE: loop exit
PB: predicated region body
PF: predicated region fallthrough
CT: control target
= control target key end

     0   :  { %10 = vsyncpa [#allocation3], 0  ;;  %s568_s0 = inlined_call_operand.hbm [shape: f32[16,32], index: 0, kind: input, shape index: {}]   ;;  %s569_s1 = inlined_call_operand.hbm [shape: bf16[32,128], index: 1, kind: input, shape index: {}]   ;;  %s570_s2 = inlined_call_operand.vmem [shape: f32[1,128], index: 2, kind: input, shape index: {}]   ;;  %s571_s3 = inlined_call_operand.hbm [shape: bf16[128,128], index: 3, kind: input, shape index: {}]   ;;  %s572_s4 = inlined_call_operand.vmem [shape: f32[1,128], index: 4, kind: input, shape index: {}]   ;;  %s573_s5 = inlined_call_operand.hbm [shape: f32[16,128], index: 5, kind: output, shape index: {}]  }
   0x1   :  { %11 = vsyncpa [#allocation6], 0  ;;  %s30_s20 = sshll.u32 %s569_s1, 4  ;;  %s31_s20 = int_to_ptr.hbm [resolvable:$true] %s30_s20 }
   0x2   :  { %12 = vsyncpa [#allocation4], 0  ;;  %s488_s21 = smov [#allocation5]   ;;  %s17_s25 = sshll.u32 %s568_s0, 4  ;;  %s18_s25 = int_to_ptr.hbm [resolvable:$true] %s17_s25 }
   0x3   :  { %s32_s22 = sshll.u32 %s488_s21, 4  ;;  %s489_s26 = smov 64   ;;  %s33_s22 = int_to_ptr.vmem [resolvable:$true] %s32_s22 }
   0x4   :  { %s490_s27 = smov 4   ;;  %s491_s28 = smov [#allocation2]  }
   0x5   :  { %38 = dma.hbm_to_vmem [thread:$0]  %s31_s20, 256, %s33_s22, [#allocation6], %s489_s26, %s489_s26, %s490_s27  }
   0x6   :  { %s19_s29 = sshll.u32 %s491_s28, 4  ;;  %s492_s30 = smov 128   ;;  %s20_s29 = int_to_ptr.vmem [resolvable:$true] %s19_s29 }
   0x7   :  { %s493_s6 = smov 8   ;;  %s45_s8 = sshll.u32 %s571_s3, 4  ;;  %s46_s8 = int_to_ptr.hbm [resolvable:$true] %s45_s8 }
   0x8   :  { %25 = dma.hbm_to_vmem [thread:$0]  %s18_s25, 256, %s20_s29, [#allocation3], %s492_s30, %s492_s30, %s493_s6  }
   0x9   :  { %s494_s9 = smov [#allocation7]  }
   0xa   :  { %s47_s0 = sshll.u32 %s494_s9, 4  ;;  %s48_s0 = int_to_ptr.vmem [resolvable:$true] %s47_s0 }
   0xb   :  { %53 = dma.hbm_to_vmem [thread:$0]  %s46_s8, 1024, %s48_s0, [#allocation6], %s489_s26, %s489_s26, %s490_s27  }
   0xc   :  { %482 = dma.done.wait [#allocation3], 256  }
   0xd   :  { %483 = vsyncadd [#allocation3], 4294967040 }
   0xe   :  { %484 = dma.done.wait [#allocation6], 1280  }
   0xf   :  { %485 = vsyncadd [#allocation6], 4294966016  ;;  %v363_v0 = vld [vmem:[#allocation5 + $0x8] sm:$0xff]  ;;  %v362_v1 = vld [vmem:[#allocation5] sm:$0xff]  ;;  %vm92_vm0 = vcmask 261120   ;;  %s495_s12 = smov [#allocation8]  }
  0x10   :  { %102 = vmatpush.bf16.msra.mxu0 %v363_v0  ;;  %v69_v2 = vld [vmem:[#allocation2] sm:$0xff]  ;;  %v70_v3 = vld [vmem:[#allocation2 + $0x8] sm:$0xff]  ;;  %v371_v6 = vld [vmem:[#allocation7 + $0x38] sm:$0xff]  ;;  %s303_s13 = sshll.u32 %s495_s12, 4  ;;  %s305_s16 = sshll.u32 %s573_s5, 4  ;;  %s304_s13 = int_to_ptr.vmem [resolvable:$true] %s303_s13  ;;  %s306_s16 = int_to_ptr.hbm [resolvable:$true] %s305_s16 }
  0x11   :  { %v71_v4 = vpack.c.bf16 %v70_v3, %v69_v2  ;;  %v380_v5 = vld [vmem:[%s570_s2] ss:$0 sm:$0xff]  ;;  %263 = vmatpush.bf16.msra.mxu1 %v371_v6  ;;  %v370_v10 = vld [vmem:[#allocation7 + $0x30] sm:$0xff]  ;;  %v369_v12 = vld [vmem:[#allocation7 + $0x28] sm:$0xff] }
  0x12   :  { %v368_v17 = vld [vmem:[#allocation7 + $0x20] sm:$0xff]  ;;  %v367_v23 = vld [vmem:[#allocation7 + $0x18] sm:$0xff]  ;;  %v366_v29 = vld [vmem:[#allocation7 + $0x10] sm:$0xff] }
  0x13   :  { %v365_v37 = vld [vmem:[#allocation7 + $0x8] sm:$0xff]  ;;  %v364_v44 = vld [vmem:[#allocation7] sm:$0xff] }
  0x14   :  { %103 = vmatpush.bf16.msra.mxu0 %v362_v1 }
  0x15   :  { %264 = vmatpush.bf16.msra.mxu1 %v370_v10 }
  0x17   :  { %327 = vmatmul.msk.bf16.vlgmr.msra.gmra.mxu0 %vm92_vm0, %v71_v4 }
  0x19   :  { %265 = vmatpush.bf16.msra.mxu1 %v369_v12 }
  0x1d   :  { %266 = vmatpush.bf16.msra.mxu1 %v368_v17 }
  0x21   :  { %267 = vmatpush.bf16.msra.mxu1 %v367_v23 }
  0x25   :  { %268 = vmatpush.bf16.msra.mxu1 %v366_v29 }
  0x29   :  { %269 = vmatpush.bf16.msra.mxu1 %v365_v37 }
  0x2d   :  { %270 = vmatpush.bf16.msra.mxu1 %v364_v44 }
  0x94   :  { %v105_v7 = vpop.f32.mrf.mxu0 }
  0x95   :  { %v541_v8 = vadd.f32 %v380_v5, %v105_v7 }
  0x97   :  { %v544_v9 = vmul.f32 0.70710677, %v541_v8 }
  0x99   :  { %v114_v11 = vmul.f32 %v544_v9, %v544_v9 }
  0x9b   :  { %v115_v13 = vmin.f32 %v114_v11, 16.0 }
  0x9c   :  { %v107_v14 = vpop.f32.mrf.mxu0 }
  0x9d   :  { %v116_v15 = vmul.f32 2.1237322e-06, %v115_v13  ;;  %v548_v16 = vadd.f32 %v380_v5, %v107_v14  ;;  %v127_v18 = vmul.f32 3.8918573e-05, %v115_v13 }
  0x9f   :  { %v117_v19 = vadd.f32 0.00028619796, %v116_v15  ;;  %v551_v20 = vmul.f32 0.70710677, %v548_v16  ;;  %v128_v21 = vadd.f32 0.001143296, %v127_v18 }
  0xa1   :  { %v154_v22 = vmul.f32 %v551_v20, %v551_v20  ;;  %v118_v24 = vmul.f32 %v117_v19, %v115_v13  ;;  %v129_v25 = vmul.f32 %v128_v21, %v115_v13 }
  0xa3   :  { %v155_v26 = vmin.f32 %v154_v22, 16.0  ;;  %v130_v27 = vadd.f32 0.014752088, %v129_v25  ;;  %v119_v31 = vadd.f32 0.0036580483, %v118_v24 }
  0xa5   :  { %v156_v28 = vmul.f32 2.1237322e-06, %v155_v26  ;;  %v167_v30 = vmul.f32 3.8918573e-05, %v155_v26  ;;  %v131_v32 = vmul.f32 %v130_v27, %v115_v13  ;;  %v120_v39 = vmul.f32 %v119_v31, %v115_v13 }
  0xa6   :  { %v111_v31 = vmul.f32 0.5, %v548_v16 }
  0xa7   :  { %v157_v33 = vadd.f32 0.00028619796, %v156_v28  ;;  %v168_v34 = vadd.f32 0.001143296, %v167_v30  ;;  %v132_v35 = vadd.f32 0.112945676, %v131_v32 }
  0xa8   :  { %v121_v46 = vadd.f32 0.05243302, %v120_v39  ;;  %v110_v30 = vmul.f32 0.5, %v541_v8 }
  0xa9   :  { %v158_v36 = vmul.f32 %v157_v33, %v155_v26  ;;  %v169_v38 = vmul.f32 %v168_v34, %v155_v26  ;;  %v133_v40 = vmul.f32 %v132_v35, %v115_v13 }
  0xaa   :  { %v122_v52 = vmul.f32 %v121_v46, %v115_v13 }
  0xab   :  { %v159_v41 = vadd.f32 0.0036580483, %v158_v36  ;;  %v170_v42 = vadd.f32 0.014752088, %v169_v38  ;;  %v134_v43 = vadd.f32 0.4994258, %v133_v40 }
  0xac   :  { %v123_v56 = vadd.f32 0.18741608, %v122_v52 }
  0xad   :  { %v171_v45 = vmul.f32 %v170_v42, %v155_v26  ;;  %v135_v47 = vmul.f32 %v134_v43, %v115_v13  ;;  %v160_v48 = vmul.f32 %v159_v41, %v155_v26 }
  0xae   :  { %v124_v61 = vmul.f32 %v123_v56, %v115_v13 }
  0xaf   :  { %v172_v49 = vadd.f32 0.112945676, %v171_v45  ;;  %v136_v50 = vadd.f32 1.0, %v135_v47  ;;  %v161_v53 = vadd.f32 0.05243302, %v160_v48 }
  0xb0   :  { %v125_v3 = vadd.f32 1.1283791, %v124_v61 }
  0xb1   :  { %v173_v51 = vmul.f32 %v172_v49, %v155_v26  ;;  %382 = vrcp.f32 %v136_v50  ;;  %v162_v57 = vmul.f32 %v161_v53, %v155_v26  ;;  %v148_v0 = vand.u32 2147483648, %v136_v50 }
  0xb2   :  { %v146_v2 = vand.u32 2147483647, %v136_v50  ;;  %vm142_vm2 = vweird.f32 %v136_v50  ;;  %v126_v12 = vmul.f32 %v125_v3, %v544_v9 }
  0xb3   :  { %v174_v54 = vadd.f32 0.4994258, %v173_v51  ;;  %v163_v62 = vadd.f32 0.18741608, %v162_v57  ;;  %v149_v7 = vor.u32 1.1754944e-38, %v148_v0 }
  0xb4   :  { %vm147_vm4 = vcmp.eq.f32.partialorder %v146_v2, 8.507059e+37 }
  0xb5   :  { %v175_v55 = vmul.f32 %v174_v54, %v155_v26  ;;  %v164_v5 = vmul.f32 %v163_v62, %v155_v26 }
  0xb7   :  { %v176_v58 = vadd.f32 1.0, %v175_v55  ;;  %v383_v59 = vpop.eup %382  ;;  %v165_v15 = vadd.f32 1.1283791, %v164_v5 }
  0xb8   :  { %v138_v60 = vmul.f32 %v383_v59, %v136_v50  ;;  %vm143_vm1 = vweird.f32 %v383_v59 }
  0xb9   :  { %384 = vrcp.f32 %v176_v58  ;;  %vm144_vm3 = vmor %vm142_vm2, %vm143_vm1  ;;  %v188_v17 = vand.u32 2147483648, %v176_v58  ;;  %v186_v21 = vand.u32 2147483647, %v176_v58  ;;  %vm182_vm6 = vweird.f32 %v176_v58 }
  0xba   :  { %v139_v63 = vsub.f32 1.0, %v138_v60  ;;  %v166_v24 = vmul.f32 %v165_v15, %v551_v20  ;;  %v381_v20 = vld [vmem:[%s572_s4] ss:$0 sm:$0xff] }
  0xbb   :  { %v189_v23 = vor.u32 1.1754944e-38, %v188_v17  ;;  %vm187_vm8 = vcmp.eq.f32.partialorder %v186_v21, 8.507059e+37 }
  0xbc   :  { %v140_v1 = vmul.f32 %v383_v59, %v139_v63 }
  0xbe   :  { %v141_v6 = vadd.f32 %v383_v59, %v140_v1 }
  0xbf   :  { %v385_v4 = vpop.eup %384 }
  0xc0   :  { %v178_v10 = vmul.f32 %v385_v4, %v176_v58  ;;  %v145_v11 = vsel %vm144_vm3, %v383_v59, %v141_v6  ;;  %vm183_vm5 = vweird.f32 %v385_v4 }
  0xc1   :  { %v150_v14 = vsel %vm147_vm4, %v149_v7, %v145_v11  ;;  %vm184_vm7 = vmor %vm182_vm6, %vm183_vm5 }
  0xc2   :  { %v179_v13 = vsub.f32 1.0, %v178_v10  ;;  %v151_v18 = vmul.f32 %v150_v14, %v126_v12 }
  0xc4   :  { %v180_v19 = vmul.f32 %v385_v4, %v179_v13  ;;  %v328_v25 = vclamps-f32 %v151_v18, 1.0 }
  0xc6   :  { %v181_v22 = vadd.f32 %v385_v4, %v180_v19  ;;  %v194_v29 = vadd.f32 1.0, %v328_v25 }
  0xc8   :  { %v185_v26 = vsel %vm184_vm7, %v385_v4, %v181_v22  ;;  %v196_v33 = vmul.f32 %v194_v29, %v110_v30 }
  0xc9   :  { %v190_v27 = vsel %vm187_vm8, %v189_v23, %v185_v26 }
  0xca   :  { %v191_v28 = vmul.f32 %v190_v27, %v166_v24 }
  0xcc   :  { %v329_v9 = vclamps-f32 %v191_v28, 1.0 }
  0xce   :  { %v195_v32 = vadd.f32 1.0, %v329_v9 }
  0xd0   :  { %v197_v34 = vmul.f32 %v195_v32, %v111_v31 }
  0xd2   :  { %v198_v35 = vpack.c.bf16 %v197_v34, %v196_v33 }
  0xd4   :  { %271 = vmatmul.bf16.vlgmr.msra.gmra.mxu1 %v198_v35 }
 0x151   :  { %v272_v36 = vpop.f32.mrf.mxu1 }
 0x152   :  { %v285_v37 = vadd.f32 %v381_v20, %v272_v36 }
 0x154   :  { %287 = vst [vmem:[#allocation8] sm:$0xff] %v285_v37 }
 0x159   :  { %v274_v8 = vpop.f32.mrf.mxu1 }
 0x15a   :  { %v286_v16 = vadd.f32 %v381_v20, %v274_v8 }
 0x15c   :  { %288 = vst [vmem:[#allocation8 + $0x8] sm:$0xff] %v286_v16 }
 0x15d   :  { %311 = dma.vmem_to_hbm [thread:$0]  %s304_s13, 256, %s306_s16, [#allocation4], %s492_s30, %s492_s30, %s493_s6  }
 0x15e   :  { %486 = dma.done.wait [#allocation4], 256  }
 0x15f   :  { %487 = vsyncadd [#allocation4], 4294967040 }
 0x160   :  { %316 = vsyncpa [#allocation3], 1 }
 0x161   :  { %317 = vsyncpa [#allocation6], 1 }
 0x162   :  { %318 = vsyncpa [#allocation4], 1 }

</bundles_post_ra>
